<compile_context>
chip_gen: v5e
topology: v5e:2x2
jax: 0.10.0
libtpu: 0.0.40
codegen_flags: <defaults>
</compile_context>

<pallas_src>
import functools

import jax
import jax.numpy as jnp
import numpy as np
from jax import lax
from jax.experimental import pallas as pl
from jax.experimental.pallas import tpu as pltpu


def _attention_kernel(x_ref, w_qkv_ref, w_proj_ref, b_ref, o_ref, *, num_heads):
    """One grid step: `block_b` batch elements.

    x_ref:      (block_b, N, C)  bf16
    w_qkv_ref:  (C, 3C)          bf16  (softmax scale folded into the Q columns)
    w_proj_ref: (C, C)           bf16
    b_ref:      (1, C)           f32
    o_ref:      (block_b, N, C)  output dtype (input dtype)
    """
    block_b, N, C = x_ref.shape
    H = num_heads
    hd = C // H

    w_qkv = w_qkv_ref[...]                                   # (C, 3C) bf16
    w_proj = w_proj_ref[...]                                 # (C, C)  bf16

    # Hoisted out of all loops (JAX does not CSE broadcast_in_dim / slices).
    bias_nc = jnp.broadcast_to(b_ref[...].astype(jnp.float32), (N, C))
    w_proj_heads = [w_proj[h * hd:(h + 1) * hd, :] for h in range(H)]  # (hd, C)

    def body(b, carry):
        xb = x_ref[b].astype(jnp.bfloat16)                   # (N, C)

        # Lane-dense QKV projection: one (N, C) @ (C, 3C) MXU matmul, f32 acc.
        qkv = jnp.dot(xb, w_qkv, preferred_element_type=jnp.float32)
        qkv = qkv.astype(jnp.bfloat16)                       # (N, 3C)

        # proj(concat_h ctx_h) + bias == bias + sum_h ctx_h @ Wproj_rows_h.
        y = bias_nc                                          # (N, C) f32 accumulator
        for h in range(H):                                   # small static loop
            q_h = qkv[:, h * hd:(h + 1) * hd]                        # (N, hd)
            k_h = qkv[:, C + h * hd:C + (h + 1) * hd]                # (N, hd)
            v_h = qkv[:, 2 * C + h * hd:2 * C + (h + 1) * hd]        # (N, hd)

            # Scale is already folded into the Q weights.
            logits = jnp.einsum('td,sd->ts', q_h, k_h,
                                preferred_element_type=jnp.float32)  # (N, N) f32

            # Numerically stable softmax in f32; divide goes to the EUP.
            m = jnp.max(logits, axis=-1, keepdims=True)
            e = jnp.exp(logits - m)
            denom = jnp.sum(e, axis=-1, keepdims=True)
            attn = (e * pl.reciprocal(denom, approx=True)).astype(jnp.bfloat16)

            ctx = jnp.dot(attn, v_h, preferred_element_type=jnp.float32)
            ctx = ctx.astype(jnp.bfloat16)                            # (N, hd)

            y = y + jnp.dot(ctx, w_proj_heads[h],
                            preferred_element_type=jnp.float32)       # (N, C)

        o_ref[b] = y.astype(o_ref.dtype)
        return carry

    if block_b == 1:
        body(0, 0)
    else:
        # fori_loop bounds live ranges; only unroll very small trip counts.
        lax.fori_loop(0, block_b, body, 0, unroll=block_b <= 4)


def _pick_block_b(B, N):
    """Batch elements per grid step.

    Amortizes the ~0.35us per-step pipeline overhead (a few hundred rows per
    step) while keeping at least 2 grid steps when B allows, so the v7x
    megacore split and the DMA/compute pipeline are both active.
    """
    target_rows = 512
    bb = max(1, min(B, target_rows // max(N, 1)))
    if B >= 2:
        bb = min(bb, B // 2)
    bb = max(1, bb)
    while B % bb:
        bb -= 1
    return bb


def _vmem_limit_bytes(block_b, N, C):
    """Explicit scoped-VMEM budget: pipelined x/o + (double-buffered) weights
    + in-kernel working set, with margin.  Capped at v7x's 64 MiB physical."""
    x_blk = block_b * N * C * 2            # bf16 input block
    o_blk = block_b * N * C * 4            # f32 output block
    weights = (C * 3 * C + C * C) * 2 + C * 4
    work = N * 3 * C * 4 + 4 * N * N * 4 + 4 * N * C * 4
    est = 2 * (x_blk + o_blk) + 2 * weights + work
    return int(min(max(2 * est, 16 * 1024 * 1024), 64 * 1024 * 1024))


def attention_pallas(x, w_qkv, w_proj, b_proj, *, num_heads):
    B, N, C = x.shape
    H = num_heads
    hd = C // H
    scale = hd ** (-0.5)

    bf16 = jnp.bfloat16

    # Fold the softmax scale into the Q columns (no (N, N) scaling in-kernel).
    # qkv columns are ordered [q | k | v], each C wide, heads contiguous (hd).
    w_qkv_scaled = jnp.concatenate([w_qkv[:, :C] * scale, w_qkv[:, C:]], axis=1)
    w_qkv_b = w_qkv_scaled.astype(bf16)                      # (C, 3C)
    w_proj_b = w_proj.astype(bf16)                           # (C, C)
    b2 = b_proj.reshape(1, C).astype(jnp.float32)            # (1, C)
    x_b = x.astype(bf16)                                     # (B, N, C)

    block_b = _pick_block_b(B, N)
    grid = (B // block_b,)

    kernel = functools.partial(_attention_kernel, num_heads=H)

    out = pl.pallas_call(
        kernel,
        out_shape=jax.ShapeDtypeStruct((B, N, C), x.dtype),
        grid_spec=pltpu.PrefetchScalarGridSpec(
            num_scalar_prefetch=0,
            grid=grid,
            in_specs=[
                # x: 3-D block; trailing dims equal full array -> always legal.
                pl.BlockSpec((block_b, N, C), lambda i: (i, 0, 0)),
                # Grid-invariant weights / bias (constant index maps).
                pl.BlockSpec((C, 3 * C), lambda i: (0, 0)),
                pl.BlockSpec((C, C), lambda i: (0, 0)),
                pl.BlockSpec((1, C), lambda i: (0, 0)),
            ],
            out_specs=pl.BlockSpec((block_b, N, C), lambda i: (i, 0, 0)),
        ),
        compiler_params=pltpu.CompilerParams(
            dimension_semantics=("parallel",),
            vmem_limit_bytes=_vmem_limit_bytes(block_b, N, C)),
    )(x_b, w_qkv_b, w_proj_b, b2)

    return out


def attention_reference(x, w_qkv, w_proj, b_proj, *, num_heads):
    """Pure-JAX f32 reference matching the PyTorch forward (eval mode)."""
    B, N, C = x.shape
    hd = C // num_heads
    scale = hd ** (-0.5)
    qkv = x @ w_qkv                                            # (B, N, 3C)
    qkv = qkv.reshape(B, N, 3, num_heads, hd).transpose(2, 0, 3, 1, 4)
    q, k, v = qkv[0], qkv[1], qkv[2]                           # (B, H, N, hd)
    attn = jnp.einsum('bhnd,bhmd->bhnm', q, k) * scale
    attn = jax.nn.softmax(attn, axis=-1)
    out = jnp.einsum('bhnm,bhmd->bhnd', attn, v)
    out = out.transpose(0, 2, 1, 3).reshape(B, N, C)
    return out @ w_proj + b_proj


if __name__ == "__main__":
    # Small shapes consistent with the module: dim=32, num_heads=8 -> head_dim=4
    B, N, C = 2, 8, 32
    num_heads = 8

    key = jax.random.PRNGKey(0)
    kx, kw1, kw2, kb = jax.random.split(key, 4)

    x = jax.random.normal(kx, (B, N, C), dtype=jnp.float32)
    # Module shapes: qkv Linear(C, 3C, bias=False), proj Linear(C, C, bias=True),
    # weights stored as (in, out).
    w_qkv = jax.random.normal(kw1, (C, 3 * C), dtype=jnp.float32) * 0.05
    w_proj = jax.random.normal(kw2, (C, C), dtype=jnp.float32) * 0.05
    b_proj = jax.random.normal(kb, (C,), dtype=jnp.float32) * 0.01

    out = attention_pallas(x, w_qkv, w_proj, b_proj, num_heads=num_heads)
    out = jax.block_until_ready(out)

    ref = attention_reference(x, w_qkv, w_proj, b_proj, num_heads=num_heads)
    # bf16 matmul operands (f32 accumulation) + approx reciprocal -> loosened
    # tolerance vs f32 reference.
    np.testing.assert_allclose(np.asarray(out), np.asarray(ref),
                               rtol=2e-2, atol=2e-2)

    print("KERNEL_OK")
</pallas_src>

<mosaic_0001>
module attributes {stable_mosaic.version = 11 : i64} {
  func.func @_attention_kernel(%arg0: i32, %arg1: memref<1x8x32xbf16, #tpu.memory_space<vmem>>, %arg2: memref<32x96xbf16, #tpu.memory_space<vmem>>, %arg3: memref<32x32xbf16, #tpu.memory_space<vmem>>, %arg4: memref<1x32xf32, #tpu.memory_space<vmem>>, %arg5: memref<1x8x32xf32, #tpu.memory_space<vmem>>) attributes {dimension_semantics = [#tpu.dimension_semantics<parallel>], iteration_bounds = array<i64: 2>, scalar_prefetch = 0 : i64, scratch_operands = 0 : i64, tpu.core_type = #tpu.core_type<tc>, window_params = [{transform_indices = @transform_0, window_bounds = array<i64: 1, 8, 32>}, {pipeline_mode = #tpu.pipeline_mode<synchronous>, transform_indices = @transform_1, window_bounds = array<i64: 32, 96>}, {pipeline_mode = #tpu.pipeline_mode<synchronous>, transform_indices = @transform_2, window_bounds = array<i64: 32, 32>}, {pipeline_mode = #tpu.pipeline_mode<synchronous>, transform_indices = @transform_3, window_bounds = array<i64: 1, 32>}, {transform_indices = @transform_4, window_bounds = array<i64: 1, 8, 32>}]} {
    %c0 = arith.constant 0 : index
    %c0_0 = arith.constant 0 : index
    %0 = vector.load %arg2[%c0, %c0_0] : memref<32x96xbf16, #tpu.memory_space<vmem>>, vector<32x96xbf16>
    %c0_1 = arith.constant 0 : index
    %c0_2 = arith.constant 0 : index
    %1 = vector.load %arg3[%c0_1, %c0_2] : memref<32x32xbf16, #tpu.memory_space<vmem>>, vector<32x32xbf16>
    %c0_3 = arith.constant 0 : index
    %c0_4 = arith.constant 0 : index
    %2 = vector.load %arg4[%c0_3, %c0_4] : memref<1x32xf32, #tpu.memory_space<vmem>>, vector<1x32xf32>
    %3 = vector.shape_cast %2 : vector<1x32xf32> to vector<1x32xf32>
    %4 = vector.broadcast %3 : vector<1x32xf32> to vector<8x32xf32>
    %5 = vector.extract_strided_slice %1 {offsets = [0, 0], sizes = [4, 32], strides = [1, 1]} : vector<32x32xbf16> to vector<4x32xbf16>
    %6 = vector.extract_strided_slice %1 {offsets = [4, 0], sizes = [4, 32], strides = [1, 1]} : vector<32x32xbf16> to vector<4x32xbf16>
    %7 = vector.extract_strided_slice %1 {offsets = [8, 0], sizes = [4, 32], strides = [1, 1]} : vector<32x32xbf16> to vector<4x32xbf16>
    %8 = vector.extract_strided_slice %1 {offsets = [12, 0], sizes = [4, 32], strides = [1, 1]} : vector<32x32xbf16> to vector<4x32xbf16>
    %9 = vector.extract_strided_slice %1 {offsets = [16, 0], sizes = [4, 32], strides = [1, 1]} : vector<32x32xbf16> to vector<4x32xbf16>
    %10 = vector.extract_strided_slice %1 {offsets = [20, 0], sizes = [4, 32], strides = [1, 1]} : vector<32x32xbf16> to vector<4x32xbf16>
    %11 = vector.extract_strided_slice %1 {offsets = [24, 0], sizes = [4, 32], strides = [1, 1]} : vector<32x32xbf16> to vector<4x32xbf16>
    %12 = vector.extract_strided_slice %1 {offsets = [28, 0], sizes = [4, 32], strides = [1, 1]} : vector<32x32xbf16> to vector<4x32xbf16>
    %c0_5 = arith.constant 0 : index
    %c0_6 = arith.constant 0 : index
    %c0_7 = arith.constant 0 : index
    %13 = vector.load %arg1[%c0_5, %c0_6, %c0_7] : memref<1x8x32xbf16, #tpu.memory_space<vmem>>, vector<1x8x32xbf16>
    %14 = vector.shape_cast %13 : vector<1x8x32xbf16> to vector<8x32xbf16>
    %cst = arith.constant dense<0.000000e+00> : vector<8x96xf32>
    %15 = tpu.matmul %14, %0, %cst {dimension_numbers = #tpu.dot_dimension_numbers<[1], [0], [0], [1], [0, 0, 1, 1], [], []>} : vector<8x32xbf16>, vector<32x96xbf16>, vector<8x96xf32> -> vector<8x96xf32>
    %16 = arith.truncf %15 : vector<8x96xf32> to vector<8x96xbf16>
    %17 = vector.extract_strided_slice %16 {offsets = [0, 0], sizes = [8, 4], strides = [1, 1]} : vector<8x96xbf16> to vector<8x4xbf16>
    %18 = vector.extract_strided_slice %16 {offsets = [0, 32], sizes = [8, 4], strides = [1, 1]} : vector<8x96xbf16> to vector<8x4xbf16>
    %19 = vector.extract_strided_slice %16 {offsets = [0, 64], sizes = [8, 4], strides = [1, 1]} : vector<8x96xbf16> to vector<8x4xbf16>
    "tpu.trace_start"() <{level = 10 : i32, message = "td,sd->ts"}> : () -> ()
    %cst_8 = arith.constant dense<0.000000e+00> : vector<8x8xf32>
    %20 = tpu.matmul %17, %18, %cst_8 {dimension_numbers = #tpu.dot_dimension_numbers<[1], [1], [0], [0], [0, 0, 1, 0], [], []>} : vector<8x4xbf16>, vector<8x4xbf16>, vector<8x8xf32> -> vector<8x8xf32>
    "tpu.trace_stop"() : () -> ()
    %cst_9 = arith.constant dense<0xFF800000> : vector<8xf32>
    %21 = vector.multi_reduction <maximumf>, %20, %cst_9 [1] : vector<8x8xf32> to vector<8xf32>
    %22 = vector.shape_cast %21 : vector<8xf32> to vector<8x1xf32>
    %23 = vector.broadcast %22 : vector<8x1xf32> to vector<8x8xf32>
    %24 = arith.subf %20, %23 : vector<8x8xf32>
    %25 = math.exp %24 : vector<8x8xf32>
    %cst_10 = arith.constant dense<0.000000e+00> : vector<8xf32>
    %26 = vector.multi_reduction <add>, %25, %cst_10 [1] : vector<8x8xf32> to vector<8xf32>
    %27 = vector.shape_cast %26 : vector<8xf32> to vector<8x1xf32>
    %28 = tpu.reciprocal %27 {approx = true} : vector<8x1xf32> -> vector<8x1xf32>
    %29 = vector.broadcast %28 : vector<8x1xf32> to vector<8x8xf32>
    %30 = arith.mulf %25, %29 : vector<8x8xf32>
    %31 = arith.truncf %30 : vector<8x8xf32> to vector<8x8xbf16>
    %cst_11 = arith.constant dense<0.000000e+00> : vector<8x4xf32>
    %32 = tpu.matmul %31, %19, %cst_11 {dimension_numbers = #tpu.dot_dimension_numbers<[1], [0], [0], [1], [0, 0, 1, 1], [], []>} : vector<8x8xbf16>, vector<8x4xbf16>, vector<8x4xf32> -> vector<8x4xf32>
    %33 = arith.truncf %32 : vector<8x4xf32> to vector<8x4xbf16>
    %cst_12 = arith.constant dense<0.000000e+00> : vector<8x32xf32>
    %34 = tpu.matmul %33, %5, %cst_12 {dimension_numbers = #tpu.dot_dimension_numbers<[1], [0], [0], [1], [0, 0, 1, 1], [], []>} : vector<8x4xbf16>, vector<4x32xbf16>, vector<8x32xf32> -> vector<8x32xf32>
    %35 = arith.addf %4, %34 : vector<8x32xf32>
    %36 = vector.extract_strided_slice %16 {offsets = [0, 4], sizes = [8, 4], strides = [1, 1]} : vector<8x96xbf16> to vector<8x4xbf16>
    %37 = vector.extract_strided_slice %16 {offsets = [0, 36], sizes = [8, 4], strides = [1, 1]} : vector<8x96xbf16> to vector<8x4xbf16>
    %38 = vector.extract_strided_slice %16 {offsets = [0, 68], sizes = [8, 4], strides = [1, 1]} : vector<8x96xbf16> to vector<8x4xbf16>
    "tpu.trace_start"() <{level = 10 : i32, message = "td,sd->ts"}> : () -> ()
    %cst_13 = arith.constant dense<0.000000e+00> : vector<8x8xf32>
    %39 = tpu.matmul %36, %37, %cst_13 {dimension_numbers = #tpu.dot_dimension_numbers<[1], [1], [0], [0], [0, 0, 1, 0], [], []>} : vector<8x4xbf16>, vector<8x4xbf16>, vector<8x8xf32> -> vector<8x8xf32>
    "tpu.trace_stop"() : () -> ()
    %cst_14 = arith.constant dense<0xFF800000> : vector<8xf32>
    %40 = vector.multi_reduction <maximumf>, %39, %cst_14 [1] : vector<8x8xf32> to vector<8xf32>
    %41 = vector.shape_cast %40 : vector<8xf32> to vector<8x1xf32>
    %42 = vector.broadcast %41 : vector<8x1xf32> to vector<8x8xf32>
    %43 = arith.subf %39, %42 : vector<8x8xf32>
    %44 = math.exp %43 : vector<8x8xf32>
    %cst_15 = arith.constant dense<0.000000e+00> : vector<8xf32>
    %45 = vector.multi_reduction <add>, %44, %cst_15 [1] : vector<8x8xf32> to vector<8xf32>
    %46 = vector.shape_cast %45 : vector<8xf32> to vector<8x1xf32>
    %47 = tpu.reciprocal %46 {approx = true} : vector<8x1xf32> -> vector<8x1xf32>
    %48 = vector.broadcast %47 : vector<8x1xf32> to vector<8x8xf32>
    %49 = arith.mulf %44, %48 : vector<8x8xf32>
    %50 = arith.truncf %49 : vector<8x8xf32> to vector<8x8xbf16>
    %cst_16 = arith.constant dense<0.000000e+00> : vector<8x4xf32>
    %51 = tpu.matmul %50, %38, %cst_16 {dimension_numbers = #tpu.dot_dimension_numbers<[1], [0], [0], [1], [0, 0, 1, 1], [], []>} : vector<8x8xbf16>, vector<8x4xbf16>, vector<8x4xf32> -> vector<8x4xf32>
    %52 = arith.truncf %51 : vector<8x4xf32> to vector<8x4xbf16>
    %cst_17 = arith.constant dense<0.000000e+00> : vector<8x32xf32>
    %53 = tpu.matmul %52, %6, %cst_17 {dimension_numbers = #tpu.dot_dimension_numbers<[1], [0], [0], [1], [0, 0, 1, 1], [], []>} : vector<8x4xbf16>, vector<4x32xbf16>, vector<8x32xf32> -> vector<8x32xf32>
    %54 = arith.addf %35, %53 : vector<8x32xf32>
    %55 = vector.extract_strided_slice %16 {offsets = [0, 8], sizes = [8, 4], strides = [1, 1]} : vector<8x96xbf16> to vector<8x4xbf16>
    %56 = vector.extract_strided_slice %16 {offsets = [0, 40], sizes = [8, 4], strides = [1, 1]} : vector<8x96xbf16> to vector<8x4xbf16>
    %57 = vector.extract_strided_slice %16 {offsets = [0, 72], sizes = [8, 4], strides = [1, 1]} : vector<8x96xbf16> to vector<8x4xbf16>
    "tpu.trace_start"() <{level = 10 : i32, message = "td,sd->ts"}> : () -> ()
    %cst_18 = arith.constant dense<0.000000e+00> : vector<8x8xf32>
    %58 = tpu.matmul %55, %56, %cst_18 {dimension_numbers = #tpu.dot_dimension_numbers<[1], [1], [0], [0], [0, 0, 1, 0], [], []>} : vector<8x4xbf16>, vector<8x4xbf16>, vector<8x8xf32> -> vector<8x8xf32>
    "tpu.trace_stop"() : () -> ()
    %cst_19 = arith.constant dense<0xFF800000> : vector<8xf32>
    %59 = vector.multi_reduction <maximumf>, %58, %cst_19 [1] : vector<8x8xf32> to vector<8xf32>
    %60 = vector.shape_cast %59 : vector<8xf32> to vector<8x1xf32>
    %61 = vector.broadcast %60 : vector<8x1xf32> to vector<8x8xf32>
    %62 = arith.subf %58, %61 : vector<8x8xf32>
    %63 = math.exp %62 : vector<8x8xf32>
    %cst_20 = arith.constant dense<0.000000e+00> : vector<8xf32>
    %64 = vector.multi_reduction <add>, %63, %cst_20 [1] : vector<8x8xf32> to vector<8xf32>
    %65 = vector.shape_cast %64 : vector<8xf32> to vector<8x1xf32>
    %66 = tpu.reciprocal %65 {approx = true} : vector<8x1xf32> -> vector<8x1xf32>
    %67 = vector.broadcast %66 : vector<8x1xf32> to vector<8x8xf32>
    %68 = arith.mulf %63, %67 : vector<8x8xf32>
    %69 = arith.truncf %68 : vector<8x8xf32> to vector<8x8xbf16>
    %cst_21 = arith.constant dense<0.000000e+00> : vector<8x4xf32>
    %70 = tpu.matmul %69, %57, %cst_21 {dimension_numbers = #tpu.dot_dimension_numbers<[1], [0], [0], [1], [0, 0, 1, 1], [], []>} : vector<8x8xbf16>, vector<8x4xbf16>, vector<8x4xf32> -> vector<8x4xf32>
    %71 = arith.truncf %70 : vector<8x4xf32> to vector<8x4xbf16>
    %cst_22 = arith.constant dense<0.000000e+00> : vector<8x32xf32>
    %72 = tpu.matmul %71, %7, %cst_22 {dimension_numbers = #tpu.dot_dimension_numbers<[1], [0], [0], [1], [0, 0, 1, 1], [], []>} : vector<8x4xbf16>, vector<4x32xbf16>, vector<8x32xf32> -> vector<8x32xf32>
    %73 = arith.addf %54, %72 : vector<8x32xf32>
    %74 = vector.extract_strided_slice %16 {offsets = [0, 12], sizes = [8, 4], strides = [1, 1]} : vector<8x96xbf16> to vector<8x4xbf16>
    %75 = vector.extract_strided_slice %16 {offsets = [0, 44], sizes = [8, 4], strides = [1, 1]} : vector<8x96xbf16> to vector<8x4xbf16>
    %76 = vector.extract_strided_slice %16 {offsets = [0, 76], sizes = [8, 4], strides = [1, 1]} : vector<8x96xbf16> to vector<8x4xbf16>
    "tpu.trace_start"() <{level = 10 : i32, message = "td,sd->ts"}> : () -> ()
    %cst_23 = arith.constant dense<0.000000e+00> : vector<8x8xf32>
    %77 = tpu.matmul %74, %75, %cst_23 {dimension_numbers = #tpu.dot_dimension_numbers<[1], [1], [0], [0], [0, 0, 1, 0], [], []>} : vector<8x4xbf16>, vector<8x4xbf16>, vector<8x8xf32> -> vector<8x8xf32>
    "tpu.trace_stop"() : () -> ()
    %cst_24 = arith.constant dense<0xFF800000> : vector<8xf32>
    %78 = vector.multi_reduction <maximumf>, %77, %cst_24 [1] : vector<8x8xf32> to vector<8xf32>
    %79 = vector.shape_cast %78 : vector<8xf32> to vector<8x1xf32>
    %80 = vector.broadcast %79 : vector<8x1xf32> to vector<8x8xf32>
    %81 = arith.subf %77, %80 : vector<8x8xf32>
    %82 = math.exp %81 : vector<8x8xf32>
    %cst_25 = arith.constant dense<0.000000e+00> : vector<8xf32>
    %83 = vector.multi_reduction <add>, %82, %cst_25 [1] : vector<8x8xf32> to vector<8xf32>
    %84 = vector.shape_cast %83 : vector<8xf32> to vector<8x1xf32>
    %85 = tpu.reciprocal %84 {approx = true} : vector<8x1xf32> -> vector<8x1xf32>
    %86 = vector.broadcast %85 : vector<8x1xf32> to vector<8x8xf32>
    %87 = arith.mulf %82, %86 : vector<8x8xf32>
    %88 = arith.truncf %87 : vector<8x8xf32> to vector<8x8xbf16>
    %cst_26 = arith.constant dense<0.000000e+00> : vector<8x4xf32>
    %89 = tpu.matmul %88, %76, %cst_26 {dimension_numbers = #tpu.dot_dimension_numbers<[1], [0], [0], [1], [0, 0, 1, 1], [], []>} : vector<8x8xbf16>, vector<8x4xbf16>, vector<8x4xf32> -> vector<8x4xf32>
    %90 = arith.truncf %89 : vector<8x4xf32> to vector<8x4xbf16>
    %cst_27 = arith.constant dense<0.000000e+00> : vector<8x32xf32>
    %91 = tpu.matmul %90, %8, %cst_27 {dimension_numbers = #tpu.dot_dimension_numbers<[1], [0], [0], [1], [0, 0, 1, 1], [], []>} : vector<8x4xbf16>, vector<4x32xbf16>, vector<8x32xf32> -> vector<8x32xf32>
    %92 = arith.addf %73, %91 : vector<8x32xf32>
    %93 = vector.extract_strided_slice %16 {offsets = [0, 16], sizes = [8, 4], strides = [1, 1]} : vector<8x96xbf16> to vector<8x4xbf16>
    %94 = vector.extract_strided_slice %16 {offsets = [0, 48], sizes = [8, 4], strides = [1, 1]} : vector<8x96xbf16> to vector<8x4xbf16>
    %95 = vector.extract_strided_slice %16 {offsets = [0, 80], sizes = [8, 4], strides = [1, 1]} : vector<8x96xbf16> to vector<8x4xbf16>
    "tpu.trace_start"() <{level = 10 : i32, message = "td,sd->ts"}> : () -> ()
    %cst_28 = arith.constant dense<0.000000e+00> : vector<8x8xf32>
    %96 = tpu.matmul %93, %94, %cst_28 {dimension_numbers = #tpu.dot_dimension_numbers<[1], [1], [0], [0], [0, 0, 1, 0], [], []>} : vector<8x4xbf16>, vector<8x4xbf16>, vector<8x8xf32> -> vector<8x8xf32>
    "tpu.trace_stop"() : () -> ()
    %cst_29 = arith.constant dense<0xFF800000> : vector<8xf32>
    %97 = vector.multi_reduction <maximumf>, %96, %cst_29 [1] : vector<8x8xf32> to vector<8xf32>
    %98 = vector.shape_cast %97 : vector<8xf32> to vector<8x1xf32>
    %99 = vector.broadcast %98 : vector<8x1xf32> to vector<8x8xf32>
    %100 = arith.subf %96, %99 : vector<8x8xf32>
    %101 = math.exp %100 : vector<8x8xf32>
    %cst_30 = arith.constant dense<0.000000e+00> : vector<8xf32>
    %102 = vector.multi_reduction <add>, %101, %cst_30 [1] : vector<8x8xf32> to vector<8xf32>
    %103 = vector.shape_cast %102 : vector<8xf32> to vector<8x1xf32>
    %104 = tpu.reciprocal %103 {approx = true} : vector<8x1xf32> -> vector<8x1xf32>
    %105 = vector.broadcast %104 : vector<8x1xf32> to vector<8x8xf32>
    %106 = arith.mulf %101, %105 : vector<8x8xf32>
    %107 = arith.truncf %106 : vector<8x8xf32> to vector<8x8xbf16>
    %cst_31 = arith.constant dense<0.000000e+00> : vector<8x4xf32>
    %108 = tpu.matmul %107, %95, %cst_31 {dimension_numbers = #tpu.dot_dimension_numbers<[1], [0], [0], [1], [0, 0, 1, 1], [], []>} : vector<8x8xbf16>, vector<8x4xbf16>, vector<8x4xf32> -> vector<8x4xf32>
    %109 = arith.truncf %108 : vector<8x4xf32> to vector<8x4xbf16>
    %cst_32 = arith.constant dense<0.000000e+00> : vector<8x32xf32>
    %110 = tpu.matmul %109, %9, %cst_32 {dimension_numbers = #tpu.dot_dimension_numbers<[1], [0], [0], [1], [0, 0, 1, 1], [], []>} : vector<8x4xbf16>, vector<4x32xbf16>, vector<8x32xf32> -> vector<8x32xf32>
    %111 = arith.addf %92, %110 : vector<8x32xf32>
    %112 = vector.extract_strided_slice %16 {offsets = [0, 20], sizes = [8, 4], strides = [1, 1]} : vector<8x96xbf16> to vector<8x4xbf16>
    %113 = vector.extract_strided_slice %16 {offsets = [0, 52], sizes = [8, 4], strides = [1, 1]} : vector<8x96xbf16> to vector<8x4xbf16>
    %114 = vector.extract_strided_slice %16 {offsets = [0, 84], sizes = [8, 4], strides = [1, 1]} : vector<8x96xbf16> to vector<8x4xbf16>
    "tpu.trace_start"() <{level = 10 : i32, message = "td,sd->ts"}> : () -> ()
    %cst_33 = arith.constant dense<0.000000e+00> : vector<8x8xf32>
    %115 = tpu.matmul %112, %113, %cst_33 {dimension_numbers = #tpu.dot_dimension_numbers<[1], [1], [0], [0], [0, 0, 1, 0], [], []>} : vector<8x4xbf16>, vector<8x4xbf16>, vector<8x8xf32> -> vector<8x8xf32>
    "tpu.trace_stop"() : () -> ()
    %cst_34 = arith.constant dense<0xFF800000> : vector<8xf32>
    %116 = vector.multi_reduction <maximumf>, %115, %cst_34 [1] : vector<8x8xf32> to vector<8xf32>
    %117 = vector.shape_cast %116 : vector<8xf32> to vector<8x1xf32>
    %118 = vector.broadcast %117 : vector<8x1xf32> to vector<8x8xf32>
    %119 = arith.subf %115, %118 : vector<8x8xf32>
    %120 = math.exp %119 : vector<8x8xf32>
    %cst_35 = arith.constant dense<0.000000e+00> : vector<8xf32>
    %121 = vector.multi_reduction <add>, %120, %cst_35 [1] : vector<8x8xf32> to vector<8xf32>
    %122 = vector.shape_cast %121 : vector<8xf32> to vector<8x1xf32>
    %123 = tpu.reciprocal %122 {approx = true} : vector<8x1xf32> -> vector<8x1xf32>
    %124 = vector.broadcast %123 : vector<8x1xf32> to vector<8x8xf32>
    %125 = arith.mulf %120, %124 : vector<8x8xf32>
    %126 = arith.truncf %125 : vector<8x8xf32> to vector<8x8xbf16>
    %cst_36 = arith.constant dense<0.000000e+00> : vector<8x4xf32>
    %127 = tpu.matmul %126, %114, %cst_36 {dimension_numbers = #tpu.dot_dimension_numbers<[1], [0], [0], [1], [0, 0, 1, 1], [], []>} : vector<8x8xbf16>, vector<8x4xbf16>, vector<8x4xf32> -> vector<8x4xf32>
    %128 = arith.truncf %127 : vector<8x4xf32> to vector<8x4xbf16>
    %cst_37 = arith.constant dense<0.000000e+00> : vector<8x32xf32>
    %129 = tpu.matmul %128, %10, %cst_37 {dimension_numbers = #tpu.dot_dimension_numbers<[1], [0], [0], [1], [0, 0, 1, 1], [], []>} : vector<8x4xbf16>, vector<4x32xbf16>, vector<8x32xf32> -> vector<8x32xf32>
    %130 = arith.addf %111, %129 : vector<8x32xf32>
    %131 = vector.extract_strided_slice %16 {offsets = [0, 24], sizes = [8, 4], strides = [1, 1]} : vector<8x96xbf16> to vector<8x4xbf16>
    %132 = vector.extract_strided_slice %16 {offsets = [0, 56], sizes = [8, 4], strides = [1, 1]} : vector<8x96xbf16> to vector<8x4xbf16>
    %133 = vector.extract_strided_slice %16 {offsets = [0, 88], sizes = [8, 4], strides = [1, 1]} : vector<8x96xbf16> to vector<8x4xbf16>
    "tpu.trace_start"() <{level = 10 : i32, message = "td,sd->ts"}> : () -> ()
    %cst_38 = arith.constant dense<0.000000e+00> : vector<8x8xf32>
    %134 = tpu.matmul %131, %132, %cst_38 {dimension_numbers = #tpu.dot_dimension_numbers<[1], [1], [0], [0], [0, 0, 1, 0], [], []>} : vector<8x4xbf16>, vector<8x4xbf16>, vector<8x8xf32> -> vector<8x8xf32>
    "tpu.trace_stop"() : () -> ()
    %cst_39 = arith.constant dense<0xFF800000> : vector<8xf32>
    %135 = vector.multi_reduction <maximumf>, %134, %cst_39 [1] : vector<8x8xf32> to vector<8xf32>
    %136 = vector.shape_cast %135 : vector<8xf32> to vector<8x1xf32>
    %137 = vector.broadcast %136 : vector<8x1xf32> to vector<8x8xf32>
    %138 = arith.subf %134, %137 : vector<8x8xf32>
    %139 = math.exp %138 : vector<8x8xf32>
    %cst_40 = arith.constant dense<0.000000e+00> : vector<8xf32>
    %140 = vector.multi_reduction <add>, %139, %cst_40 [1] : vector<8x8xf32> to vector<8xf32>
    %141 = vector.shape_cast %140 : vector<8xf32> to vector<8x1xf32>
    %142 = tpu.reciprocal %141 {approx = true} : vector<8x1xf32> -> vector<8x1xf32>
    %143 = vector.broadcast %142 : vector<8x1xf32> to vector<8x8xf32>
    %144 = arith.mulf %139, %143 : vector<8x8xf32>
    %145 = arith.truncf %144 : vector<8x8xf32> to vector<8x8xbf16>
    %cst_41 = arith.constant dense<0.000000e+00> : vector<8x4xf32>
    %146 = tpu.matmul %145, %133, %cst_41 {dimension_numbers = #tpu.dot_dimension_numbers<[1], [0], [0], [1], [0, 0, 1, 1], [], []>} : vector<8x8xbf16>, vector<8x4xbf16>, vector<8x4xf32> -> vector<8x4xf32>
    %147 = arith.truncf %146 : vector<8x4xf32> to vector<8x4xbf16>
    %cst_42 = arith.constant dense<0.000000e+00> : vector<8x32xf32>
    %148 = tpu.matmul %147, %11, %cst_42 {dimension_numbers = #tpu.dot_dimension_numbers<[1], [0], [0], [1], [0, 0, 1, 1], [], []>} : vector<8x4xbf16>, vector<4x32xbf16>, vector<8x32xf32> -> vector<8x32xf32>
    %149 = arith.addf %130, %148 : vector<8x32xf32>
    %150 = vector.extract_strided_slice %16 {offsets = [0, 28], sizes = [8, 4], strides = [1, 1]} : vector<8x96xbf16> to vector<8x4xbf16>
    %151 = vector.extract_strided_slice %16 {offsets = [0, 60], sizes = [8, 4], strides = [1, 1]} : vector<8x96xbf16> to vector<8x4xbf16>
    %152 = vector.extract_strided_slice %16 {offsets = [0, 92], sizes = [8, 4], strides = [1, 1]} : vector<8x96xbf16> to vector<8x4xbf16>
    "tpu.trace_start"() <{level = 10 : i32, message = "td,sd->ts"}> : () -> ()
    %cst_43 = arith.constant dense<0.000000e+00> : vector<8x8xf32>
    %153 = tpu.matmul %150, %151, %cst_43 {dimension_numbers = #tpu.dot_dimension_numbers<[1], [1], [0], [0], [0, 0, 1, 0], [], []>} : vector<8x4xbf16>, vector<8x4xbf16>, vector<8x8xf32> -> vector<8x8xf32>
    "tpu.trace_stop"() : () -> ()
    %cst_44 = arith.constant dense<0xFF800000> : vector<8xf32>
    %154 = vector.multi_reduction <maximumf>, %153, %cst_44 [1] : vector<8x8xf32> to vector<8xf32>
    %155 = vector.shape_cast %154 : vector<8xf32> to vector<8x1xf32>
    %156 = vector.broadcast %155 : vector<8x1xf32> to vector<8x8xf32>
    %157 = arith.subf %153, %156 : vector<8x8xf32>
    %158 = math.exp %157 : vector<8x8xf32>
    %cst_45 = arith.constant dense<0.000000e+00> : vector<8xf32>
    %159 = vector.multi_reduction <add>, %158, %cst_45 [1] : vector<8x8xf32> to vector<8xf32>
    %160 = vector.shape_cast %159 : vector<8xf32> to vector<8x1xf32>
    %161 = tpu.reciprocal %160 {approx = true} : vector<8x1xf32> -> vector<8x1xf32>
    %162 = vector.broadcast %161 : vector<8x1xf32> to vector<8x8xf32>
    %163 = arith.mulf %158, %162 : vector<8x8xf32>
    %164 = arith.truncf %163 : vector<8x8xf32> to vector<8x8xbf16>
    %cst_46 = arith.constant dense<0.000000e+00> : vector<8x4xf32>
    %165 = tpu.matmul %164, %152, %cst_46 {dimension_numbers = #tpu.dot_dimension_numbers<[1], [0], [0], [1], [0, 0, 1, 1], [], []>} : vector<8x8xbf16>, vector<8x4xbf16>, vector<8x4xf32> -> vector<8x4xf32>
    %166 = arith.truncf %165 : vector<8x4xf32> to vector<8x4xbf16>
    %cst_47 = arith.constant dense<0.000000e+00> : vector<8x32xf32>
    %167 = tpu.matmul %166, %12, %cst_47 {dimension_numbers = #tpu.dot_dimension_numbers<[1], [0], [0], [1], [0, 0, 1, 1], [], []>} : vector<8x4xbf16>, vector<4x32xbf16>, vector<8x32xf32> -> vector<8x32xf32>
    %168 = arith.addf %149, %167 : vector<8x32xf32>
    %c0_48 = arith.constant 0 : index
    %c0_49 = arith.constant 0 : index
    %c0_50 = arith.constant 0 : index
    %169 = vector.load %arg5[%c0_48, %c0_49, %c0_50] : memref<1x8x32xf32, #tpu.memory_space<vmem>>, vector<1x8x32xf32>
    %170 = vector.shape_cast %169 : vector<1x8x32xf32> to vector<8x32xf32>
    %171 = vector.shape_cast %168 : vector<8x32xf32> to vector<1x8x32xf32>
    tpu.vector_store %arg5[%c0_48, %c0_49, %c0_50], %171 {strides = array<i32>} : memref<1x8x32xf32, #tpu.memory_space<vmem>>, vector<1x8x32xf32>,
    return
  }
  func.func @transform_0(%arg0: i32) -> (i32, i32, i32) {
    %c0_i32 = arith.constant 0 : i32
    %c0_i32_0 = arith.constant 0 : i32
    %c0_i32_1 = arith.constant 0 : i32
    return %arg0, %c0_i32, %c0_i32_0 : i32, i32, i32
  }
  func.func @transform_1(%arg0: i32) -> (i32, i32) {
    %c0_i32 = arith.constant 0 : i32
    %c0_i32_0 = arith.constant 0 : i32
    %c0_i32_1 = arith.constant 0 : i32
    return %c0_i32, %c0_i32_0 : i32, i32
  }
  func.func @transform_2(%arg0: i32) -> (i32, i32) {
    %c0_i32 = arith.constant 0 : i32
    %c0_i32_0 = arith.constant 0 : i32
    %c0_i32_1 = arith.constant 0 : i32
    return %c0_i32, %c0_i32_0 : i32, i32
  }
  func.func @transform_3(%arg0: i32) -> (i32, i32) {
    %c0_i32 = arith.constant 0 : i32
    %c0_i32_0 = arith.constant 0 : i32
    %c0_i32_1 = arith.constant 0 : i32
    return %c0_i32, %c0_i32_0 : i32, i32
  }
  func.func @transform_4(%arg0: i32) -> (i32, i32, i32) {
    %c0_i32 = arith.constant 0 : i32
    %c0_i32_0 = arith.constant 0 : i32
    %c0_i32_1 = arith.constant 0 : i32
    return %arg0, %c0_i32, %c0_i32_0 : i32, i32, i32
  }
}

</mosaic_0001>

<bundles_post_ra>
// kernel: tpu_custom_call.1
= control target key start
LH: loop header
LB: loop body
LE: loop exit
PB: predicated region body
PF: predicated region fallthrough
CT: control target
= control target key end

     0   :  { %9 = vsyncpa [#allocation3], 0  ;;  %s1671_s0 = inlined_call_operand.hbm [shape: bf16[2,8,32], index: 0, kind: input, shape index: {}]   ;;  %s1672_s1 = inlined_call_operand.hbm [shape: bf16[32,96], index: 1, kind: input, shape index: {}]   ;;  %s1673_s2 = inlined_call_operand.hbm [shape: bf16[32,32], index: 2, kind: input, shape index: {}]   ;;  %s1674_s3 = inlined_call_operand.vmem [shape: f32[1,32], index: 3, kind: input, shape index: {}]   ;;  %s1675_s4 = inlined_call_operand.hbm [shape: f32[2,8,32], index: 4, kind: output, shape index: {}]  }
   0x1   :  { %11 = vsyncpa [#allocation3 + $0x1], 0 }
   0x2   :  { %12 = vsyncpa [#allocation6], 0 }
   0x3   :  { %13 = vsyncpa [#allocation4], 0 }
   0x4   :  { %15 = vsyncpa [#allocation4 + $0x1], 0  ;;  %s1425_s15 = smov 0   ;;  %s1427_s16 = smov 0  }
   0x5   :  { %s1429_s17 = smov 0   ;;  %s1431_s18 = smov 0  }
   0x6 LB: > { %s152_s21 = sshll.u32 %s1672_s1, 4  ;;  %s1449_s22 = sadd.s32 4294967295, %s1371_s18   ;;  %s1371_s18 = sphi %s1431_s18, %s1686_s18   ;;  %s1367_s17 = sphi %s1429_s17, %s1685_s17   ;;  %s1363_s16 = sphi %s1427_s16, %s1684_s16   ;;  %s1359_s15 = sphi %s1425_s15, %s1683_s15   ;;  %s153_s21 = int_to_ptr.hbm [resolvable:$true] %s152_s21 }
   0x7   : > { %p1036_p0 = scmp.ge.s32.totalorder %s1371_s18, 1  ;;  %p42_p1 = scmp.eq.s32.totalorder %s1449_s22, 0 }
   0x8   : > { %p141_p2 = scmp.lt.s32.totalorder %s1371_s18, 3  ;;  %s1373_s24 = smov [#allocation5]  }
   0x9   : > { %s154_s25 = sshll.u32 %s1373_s24, 4  ;;  %s166_s28 = sshll.u32 %s1673_s2, 4  ;;  %s155_s25 = int_to_ptr.vmem [resolvable:$true] %s154_s25  ;;  %s167_s28 = int_to_ptr.hbm [resolvable:$true] %s166_s28 }
   0xa   : > { %p1454_p3 = pnand %p1036_p0, %p141_p2  ;;  %s1374_s29 = smov [#allocation7]  }
   0xb   : > { %s168_s30 = sshll.u32 %s1374_s29, 4  ;;  %s1375_s5 = smov 64   ;;  %s169_s30 = int_to_ptr.vmem [resolvable:$true] %s168_s30 }
   0xc   : > { %p1098_p4 = pneg %p1454_p3  ;;  %s1376_s6 = smov 4  }
   0xd   : > { %s1035_s7 = sadd.s32 4294967294, %s1371_s18   ;;  %s1468_s8 = sadd.s32 1, %s1371_s18  }
   0xe   : > { %p1099_p6 = pnand %p1098_p4, %p42_p1  ;;  %s25_s9 = ssub.s32 %s1371_s18, %s1468_s8 }
   0xf   : > { %s28_s10 = sadd.s32 1, %s1367_s17  ;;  %p26_p7 = scmp.eq.s32.totalorder %s25_s9, 0 }
  0x10   : > { %1101 = dma.hbm_to_vmem [thread:$0]  (!%p1099_p6), %s153_s21, 256, %s155_s25, [#allocation6], %s1375_s5, %s1375_s5, %s1376_s6  }
  0x11   : > { %1104 = dma.hbm_to_vmem [thread:$0]  (!%p1099_p6), %s167_s28, 256, %s169_s30, [#allocation6], %s1375_s5, %s1375_s5, %s1376_s6  }
  0x12   : > { %p35_p8 = scmp.ne.s32.totalorder %s1367_s17, %s1363_s16  ;;  %p36_p9 = scmp.eq.s32.totalorder %s1371_s18, 0 }
  0x13   : > { %p41_p10 = scmp.ne.s32.totalorder %s1363_s16, %s1359_s15  ;;  %p128_p13 = scmp.eq.s32.totalorder %s1449_s22, 1 }
  0x14   : > { %s1479_s11 = scalar_select %p26_p7, %s1367_s17, %s28_s10  }
  0x15   : > { %p1481_p11 = por %p36_p9, %p35_p8  ;;  %p1487_p12 = por %p42_p1, %p41_p10 }
  0x16   : > { %p134_p0 = scmp.eq.s32.totalorder %s1035_s7, 1  ;;  %p1115_p2 = scmp.lt.s32.totalorder %s1371_s18, 2 }
  0x17   : > { %s185_s14 = sand.u32 1, %s1367_s17   ;;  %p1494_p4 = por %p128_p13, %p35_p8 }
  0x18   : > { %p1498_p6 = por %p134_p0, %p41_p10  ;;  %s1040_s21 = sshll.u32 %s185_s14, 2 }
  0x19   : > { %s1041_s24 = sshll.u32 %s1371_s18, 2  ;;  %s189_s28 = scalar_lea.vmem [#allocation2], %s1040_s21 }
  0x1a   : > { %s193_s27 = scalar_lea.hbm %s1671_s0, %s1041_s24  ;;  %s197_s29 = sshll.u32 %s189_s28, 4  ;;  %s198_s29 = int_to_ptr.vmem [resolvable:$true] %s197_s29 }
  0x1b   : > { %s195_s30 = sshll.u32 %s193_s27, 4  ;;  %p1508_p7 = pnand %p1115_p2, %p1481_p11  ;;  %s196_s30 = int_to_ptr.hbm [resolvable:$true] %s195_s30 }
  0x1c   : > { %s186_s6 = scalar_lea.sflag [#allocation3], %s185_s14  ;;  %s1271_s7 = sshra.s32 %s196_s30, 4  ;;  %s1272_s7 = int_to_ptr.hbm [resolvable:$true] %s1271_s7 }
  0x1d   : > { %s1273_s9 = scalar_lea.hbm %s1272_s7, 4  ;;  %p1275_p9 = pneg %p1508_p7 }
  0x1e   : > { %p1274_p8 = scmp.ne.s32.totalorder %s1272_s7, %s1273_s9  ;;  %s1278_s24 = scalar_lea.hbm %s1671_s0, 8 }
  0x1f   : > { %p1279_p11 = scmp.lt.s32.totalorder %s1272_s7, %s1671_s0  ;;  %p1280_p0 = scmp.lt.s32.totalorder %s1278_s24, %s1273_s9 }
  0x20   : > { %p1276_p10 = pnand %p1275_p9, %p1274_p8 }
  0x21   : > { %p1281_p2 = por %p1280_p0, %p1279_p11 }
  0x22   : > { %p1277_p13 = pneg %p1276_p10 }
  0x24   : > { %p1282_p5 = pnand %p1281_p2, %p1277_p13 }
  0x26   : > { %1285 = shalt.err (!%p1282_p5)
}
  0x27   : > { %1108 = dma.hbm_to_vmem [thread:$0]  (!%p1508_p7), %s196_s30, 64, %s198_s29, %s186_s6  }
  0x28   : > { %206 = sbr.rel (%p1454_p3) target bundleno = 2979 (0xba3), region = 36  ;;  %s1525_s14 = sand.u32 (!%p1454_p3), 1, %s1363_s16  }
  0x29   : > { %s1043_s26 = sshll.u32 (!%p1454_p3), %s1525_s14, 2  ;;  %s209_s27 = scalar_lea.sflag (!%p1454_p3), [#allocation3], %s1525_s14 }
  0x2a   : > { %s212_s28 = scalar_lea.vmem (!%p1454_p3), [#allocation2], %s1043_s26 }
  0x2d   : > { %1346 = dma.done.wait (%p1487_p12), %s209_s27, 64  }
  0x2e   : > { %1348 = vsyncadd (%p1487_p12), %s209_s27, 4294967232 }
  0x2f   : > { %1350 = dma.done.wait (%p42_p1), [#allocation6], 512  }
  0x30   : > { %1352 = vsyncadd (%p42_p1), [#allocation6], 4294966784  ;;  %v1085_v0 = vld [vmem:[#allocation5 + $0x8] sm:$0xff]  ;;  %v1084_v1 = vld [vmem:[#allocation5] sm:$0xff]  ;;  %vm274_vm0 = vcmask 261120   ;;  %s1377_s23 = smov 92  }
  0x31   : > { %284 = vmatpush.bf16.msra.mxu0 %v1085_v0  ;;  %v261_v2 = vld [vmem:[%s212_s28] sm:$0xf]  ;;  %s1378_s13 = smov 96   ;;  %s1379_s29 = smov 124   ;;  %vm297_vm1 = vcmask 31744   ;;  %vm317_vm2 = vcmask 64512  }
  0x32   : > { %s1380_s30 = smov 60   ;;  %s1381_s5 = smov 84   ;;  %v253_v13 = vld [vmem:[#allocation7] sm:$0xf]  ;;  %vm356_vm3 = vcmask 1041408   ;;  %vm335_vm4 = vcmask 1043456  }
  0x33   : > { %s1382_s6 = smov 116   ;;  %v358_v14 = vsel %vm356_vm3, %v253_v13, 0  ;;  %v432_v15 = vunpack.c.l.b16 %v253_v13  ;;  %s1383_s7 = smov 64   ;;  %v1178_v0 = vld [vmem:[%s1674_s3] ss:$0 sm:$0xff] }
  0x34   : > { %367 = vmatpush.bf16.msra.mxu3 %v358_v14  ;;  %s1384_s9 = smov 88   ;;  %s1385_s10 = smov 120   ;;  %v254_v14 = vld [vmem:[#allocation7 + $0x4] sm:$0xf] }
  0x35   : > { %285 = vmatpush.bf16.msra.mxu0 %v1084_v1  ;;  %v433_v16 = vpack.c.b16 %v432_v15, %v432_v15  ;;  %s1386_s25 = smov 80   ;;  %s1387_s12 = smov 56   ;;  %v516_v15 = vsel %vm356_vm3, %v254_v14, 0 }
  0x36   : > { %s1388_s26 = smov 76   ;;  %s1389_s27 = smov 108  }
  0x37   : > { %v434_v17 = vrot.slane %v433_v16, 2  ;;  %s1390_s28 = smov 52   ;;  %s1081_s21 = sshll.u32 %s1449_s22, 3 }
  0x38   : > { %1055 = vmatmul.msk.bf16.vlgmr.msra.gmra.mxu0 %vm274_vm0, %v261_v2  ;;  %s1046_s24 = sshll.u32 %s1525_s14, 3 }
  0x39   : > { %v439_v18 = vsel %vm356_vm3, %v434_v17, 0 }
  0x3a   : > { %448 = vmatpush.bf16.msrb.mxu0 %v439_v18 }
  0xb5   : > { %v287_v3 = vpop.f32.mrf.mxu0 }
  0xb6   : > { %v291_v4 = vpack.c.bf16 %v287_v3, %v287_v3 }
  0xb8   : > { %v293_v5 = vunpack.c.l.b16 %v291_v4 }
  0xba   : > { %v1538_v6 = vpack.c.b16 %v293_v5, %v293_v5 }
  0xbc   : > { %376 = vrot.lane.b32.xlu2 %v1538_v6, %s1377_s23  ;;  %295 = vrot.lane.b32.xlu0 %v1538_v6, %s1378_s13  ;;  %s1391_s23 = smov 112   ;;  %s1392_s13 = smov 48  }
  0xbd   : > { %v289_v7 = vpop.f32.mrf.mxu0 }
  0xc4   : > { %374 = vrot.lane.b32.xlu2 %v1538_v6, %s1379_s29  ;;  %s1393_s29 = smov 68  }
 0x116   : > { %v377_v30 = vpop.permute.xlu2 %376 }
 0x117   : > { %v382_v34 = vsel %vm297_vm1, %v377_v30, 0 }
 0x11e   : > { %v375_v36 = vpop.permute.xlu2 %374 }
 0x12e   : > { %v296_v8 = vpop.permute.xlu0 %295 }
 0x12f   : > { %v302_v9 = vsel %vm297_vm1, %v296_v8, 0 }
 0x130   : > { %311 = vmatpush.bf16.xpose.msra.mxu1 %v302_v9 }
 0x137   : > { %1056 = vmatmul.msk.bf16.vlgmr.msra.gmra.mxu1 %vm297_vm1, %v291_v4 }
 0x1b4   : > { %v313_v10 = vpop.f32.mrf.mxu1 }
 0x1b5   : > { %v318_v11 = vsel %vm317_vm2, %v313_v10, -inf }
 0x1b6   : > { %319 = vmax.xlane.f32.xlu0 %v318_v11 }
 0x1bc   : > { %v315_v12 = vpop.f32.mrf.mxu1 }
 0x1ca   : > { %409 = vrot.lane.b32.xlu0 %v1538_v6, %s1380_s30  ;;  %s1394_s30 = smov 104  }
 0x1d2   : > { %534 = vrot.lane.b32.xlu0 %v1538_v6, %s1381_s5  ;;  %s1395_s5 = smov 44  }
 0x1da   : > { %532 = vrot.lane.b32.xlu0 %v1538_v6, %s1382_s6  ;;  %s1396_s6 = smov 100  }
 0x229   : > { %v320_v19 = vpop.xlane.xlu0 %319 }
 0x22a   : > { %v321_v20 = vsub.f32 %v313_v10, %v320_v19 }
 0x22c   : > { %v322_v21 = vmul.f32 1.442695, %v321_v20  ;;  %v590_v20 = vunpack.c.l.b16 %v254_v14 }
 0x22e   : > { %1179 = vpow2.f32 %v322_v21 }
 0x234   : > { %v1180_v22 = vpop.eup %1179 }
 0x235   : > { %v324_v23 = vsel %vm317_vm2, %v1180_v22, 0.0 }
 0x236   : > { %325 = vadd.xlane.f32.xlu1 %v324_v23 }
 0x23c   : > { %v410_v24 = vpop.permute.xlu0 %409 }
 0x23d   : > { %v415_v25 = vsel %vm335_vm4, %v410_v24, 0 }
 0x23e   : > { %424 = vmatpush.bf16.msrb.mxu3 %v415_v25 }
 0x244   : > { %v535_v26 = vpop.permute.xlu0 %534 }
 0x245   : > { %v540_v27 = vsel %vm297_vm1, %v535_v26, 0 }
 0x246   : > { %549 = vmatpush.bf16.xpose.msra.mxu0 %v540_v27 }
 0x24c   : > { %v533_v63 = vpop.permute.xlu0 %532 }
 0x24f   : > { %330 = vrot.lane.b32.xlu1 %v1538_v6, %s1383_s7  ;;  %s1397_s7 = smov 72  }
 0x2a9   : > { %v326_v28 = vpop.xlane.xlu1 %325 }
 0x2aa   : > { %1181 = vrcp.f32 %v326_v28 }
 0x2b0   : > { %v1182_v29 = vpop.eup %1181 }
 0x2b1   : > { %v328_v31 = vmul.f32 %v1182_v29, %v1180_v22  ;;  %v591_v22 = vpack.c.b16 %v590_v20, %v590_v20 }
 0x2b3   : > { %v329_v35 = vpack.c.bf16 %v328_v31, %v328_v31  ;;  %v592_v26 = vrot.slane %v591_v22, 2 }
 0x2b5   : > { %v597_v30 = vsel %vm356_vm3, %v592_v26, 0 }
 0x2c1   : > { %v331_v32 = vpop.permute.xlu1 %330 }
 0x2c2   : > { %v337_v33 = vsel %vm335_vm4, %v331_v32, 0 }
 0x2c3   : > { %346 = vmatpush.bf16.msra.mxu2 %v337_v33 }
 0x2c6   : > { %1057 = vmatmul.msk.bf16.vlgmr.msra.gmra.mxu2 %vm317_vm2, %v329_v35 }
 0x2c7   : > { %391 = vmatpush.bf16.xpose.msrb.mxu2 %v382_v34 }
 0x2d6   : > { %1059 = vmatmul.msk.bf16.vlgmr.msrb.gmra.mxu2 %vm297_vm1, %v375_v36 }
 0x349   : > { %v348_v37 = vpop.f32.mrf.mxu2 }
 0x34a   : > { %v352_v38 = vpack.c.bf16 %v348_v37, %v348_v37 }
 0x34c   : > { %1058 = vmatmul.msk.bf16.vlgmr.msra.gmra.mxu3 %vm297_vm1, %v352_v38 }
 0x34d   : > { %525 = vmatpush.bf16.msra.mxu3 %v516_v15 }
 0x351   : > { %v350_v39 = vpop.f32.mrf.mxu2 }
 0x359   : > { %v393_v40 = vpop.f32.mrf.mxu2 }
 0x35a   : > { %v397_v41 = vsel %vm317_vm2, %v393_v40, -inf }
 0x35b   : > { %398 = vmax.xlane.f32.xlu2 %v397_v41 }
 0x361   : > { %v395_v42 = vpop.f32.mrf.mxu2 }
 0x373   : > { %457 = vrot.lane.b32.xlu2 %v1538_v6, %s1384_s9  ;;  %s1398_s9 = smov 40  }
 0x3ce   : > { %v399_v43 = vpop.xlane.xlu2 %398 }
 0x3cf   : > { %v400_v44 = vsub.f32 %v393_v40, %v399_v43  ;;  %v369_v45 = vpop.f32.mrf.mxu3 }
 0x3d0   : > { %v373_v3 = vadd.f32 %v1178_v0, %v369_v45 }
 0x3d1   : > { %v401_v46 = vmul.f32 1.442695, %v400_v44 }
 0x3d3   : > { %1183 = vpow2.f32 %v401_v46 }
 0x3d6   : > { %v458_v47 = vpop.permute.xlu2 %457 }
 0x3d7   : > { %v371_v48 = vpop.f32.mrf.mxu3  ;;  %v463_v49 = vsel %vm297_vm1, %v458_v47, 0 }
 0x3d8   : > { %472 = vmatpush.bf16.xpose.msrb.mxu1 %v463_v49 }
 0x3d9   : > { %v1184_v50 = vpop.eup %1183 }
 0x3da   : > { %v403_v51 = vsel %vm317_vm2, %v1184_v50, 0.0 }
 0x3db   : > { %404 = vadd.xlane.f32.xlu1 %v403_v51 }
 0x3f4   : > { %455 = vrot.lane.b32.xlu1 %v1538_v6, %s1385_s10  ;;  %s1399_s10 = smov 36  }
 0x44e   : > { %v405_v52 = vpop.xlane.xlu1 %404 }
 0x44f   : > { %1185 = vrcp.f32 %v405_v52 }
 0x455   : > { %v1186_v53 = vpop.eup %1185 }
 0x456   : > { %v407_v54 = vmul.f32 %v1186_v53, %v1184_v50 }
 0x458   : > { %v408_v55 = vpack.c.bf16 %v407_v54, %v407_v54 }
 0x45a   : > { %1060 = vmatmul.msk.bf16.vlgmr.msrb.gmra.mxu3 %vm317_vm2, %v408_v55 }
 0x466   : > { %v456_v56 = vpop.permute.xlu1 %455 }
 0x467   : > { %1062 = vmatmul.msk.bf16.vlgmr.msrb.gmra.mxu1 %vm297_vm1, %v456_v56 }
 0x4dd   : > { %v426_v57 = vpop.f32.mrf.mxu3 }
 0x4de   : > { %v430_v58 = vpack.c.bf16 %v426_v57, %v426_v57 }
 0x4e0   : > { %1061 = vmatmul.msk.bf16.vlgmr.msrb.gmra.mxu0 %vm297_vm1, %v430_v58 }
 0x4e4   : > { %v474_v59 = vpop.f32.mrf.mxu1 }
 0x4e5   : > { %v428_v60 = vpop.f32.mrf.mxu3  ;;  %v478_v61 = vsel %vm317_vm2, %v474_v59, -inf }
 0x4e6   : > { %479 = vmax.xlane.f32.xlu2 %v478_v61 }
 0x4ec   : > { %v476_v62 = vpop.f32.mrf.mxu1 }
 0x4f0   : > { %1065 = vmatmul.msk.bf16.vlgmr.msra.gmra.mxu0 %vm297_vm1, %v533_v63 }
 0x559   : > { %v480_v1 = vpop.xlane.xlu2 %479 }
 0x55a   : > { %v481_v2 = vsub.f32 %v474_v59, %v480_v1 }
 0x55c   : > { %v482_v4 = vmul.f32 1.442695, %v481_v2 }
 0x55d   : > { %v450_v5 = vpop.f32.mrf.mxu0 }
 0x55e   : > { %1187 = vpow2.f32 %v482_v4  ;;  %v1573_v7 = vadd.f32 %v450_v5, %v373_v3  ;;  %v255_v5 = vld [vmem:[#allocation7 + $0x8] sm:$0xf] }
 0x564   : > { %v1188_v8 = vpop.eup %1187 }
 0x565   : > { %v452_v9 = vpop.f32.mrf.mxu0  ;;  %v484_v10 = vsel %vm317_vm2, %v1188_v8, 0.0 }
 0x566   : > { %485 = vadd.xlane.f32.xlu1 %v484_v10 }
 0x56d   : > { %v551_v11 = vpop.f32.mrf.mxu0 }
 0x56e   : > { %v555_v12 = vsel %vm317_vm2, %v551_v11, -inf }
 0x56f   : > { %556 = vmax.xlane.f32.xlu0 %v555_v12 }
 0x575   : > { %v553_v13 = vpop.f32.mrf.mxu0 }
 0x57f   : > { %615 = vrot.lane.b32.xlu1 %v1538_v6, %s1386_s25 }
 0x583   : > { %490 = vrot.lane.b32.xlu0 %v1538_v6, %s1387_s12 }
 0x58b   : > { %692 = vrot.lane.b32.xlu0 %v1538_v6, %s1388_s26  ;;  %s941_s26 = scalar_lea.hbm %s1675_s4, %s1081_s21 }
 0x593   : > { %690 = vrot.lane.b32.xlu0 %v1538_v6, %s1389_s27  ;;  %s247_s27 = scalar_lea.vmem [#allocation8], %s1046_s24 }
 0x5d9   : > { %v486_v19 = vpop.xlane.xlu1 %485 }
 0x5e2   : > { %v557_v16 = vpop.xlane.xlu0 %556 }
 0x5e3   : > { %v558_v17 = vsub.f32 %v551_v11, %v557_v16 }
 0x5e5   : > { %v559_v18 = vmul.f32 1.442695, %v558_v17 }
 0x5e7   : > { %1189 = vpow2.f32 %v559_v18 }
 0x5e8   : > { %1191 = vrcp.f32 %v486_v19 }
 0x5ed   : > { %v1190_v21 = vpop.eup %1189 }
 0x5ee   : > { %v561_v23 = vsel %vm317_vm2, %v1190_v21, 0.0  ;;  %v1192_v24 = vpop.eup %1191 }
 0x5ef   : > { %562 = vadd.xlane.f32.xlu2 %v561_v23  ;;  %v488_v28 = vmul.f32 %v1192_v24, %v1188_v8  ;;  %v674_v23 = vsel %vm356_vm3, %v255_v5, 0 }
 0x5f1   : > { %v616_v25 = vpop.permute.xlu1 %615  ;;  %v489_v32 = vpack.c.bf16 %v488_v28, %v488_v28 }
 0x5f2   : > { %v621_v27 = vsel %vm297_vm1, %v616_v25, 0 }
 0x5f3   : > { %630 = vmatpush.bf16.xpose.msrb.mxu3 %v621_v27 }
 0x5f5   : > { %v491_v29 = vpop.permute.xlu0 %490 }
 0x5f6   : > { %v496_v31 = vsel %vm335_vm4, %v491_v29, 0 }
 0x5f7   : > { %505 = vmatpush.bf16.msra.mxu2 %v496_v31 }
 0x5fa   : > { %1063 = vmatmul.msk.bf16.vlgmr.msra.gmra.mxu2 %vm317_vm2, %v489_v32 }
 0x5fb   : > { %606 = vmatpush.bf16.msrb.mxu2 %v597_v30 }
 0x5fd   : > { %v693_v33 = vpop.permute.xlu0 %692 }
 0x5fe   : > { %v698_v34 = vsel %vm297_vm1, %v693_v33, 0 }
 0x5ff   : > { %707 = vmatpush.bf16.xpose.msra.mxu2 %v698_v34 }
 0x605   : > { %v691_v48 = vpop.permute.xlu0 %690 }
 0x607   : > { %567 = vrot.lane.b32.xlu2 %v1538_v6, %s1390_s28  ;;  %s943_s28 = sshll.u32 %s247_s27, 4  ;;  %s944_s28 = int_to_ptr.vmem [resolvable:$true] %s943_s28 }
 0x60f   : > { %613 = vrot.lane.b32.xlu2 %v1538_v6, %s1391_s23  ;;  %s945_s23 = sshll.u32 %s941_s26, 4  ;;  %s946_s23 = int_to_ptr.hbm [resolvable:$true] %s945_s23 }
 0x662   : > { %v563_v35 = vpop.xlane.xlu2 %562 }
 0x663   : > { %1193 = vrcp.f32 %v563_v35 }
 0x669   : > { %v1194_v36 = vpop.eup %1193 }
 0x66a   : > { %v565_v37 = vmul.f32 %v1194_v36, %v1190_v21  ;;  %v568_v38 = vpop.permute.xlu2 %567 }
 0x66b   : > { %v573_v39 = vsel %vm335_vm4, %v568_v38, 0 }
 0x66c   : > { %v566_v40 = vpack.c.bf16 %v565_v37, %v565_v37  ;;  %582 = vmatpush.bf16.msra.mxu1 %v573_v39 }
 0x66f   : > { %1066 = vmatmul.msk.bf16.vlgmr.msra.gmra.mxu1 %vm317_vm2, %v566_v40 }
 0x670   : > { %683 = vmatpush.bf16.msrb.mxu1 %v674_v23 }
 0x672   : > { %v614_v44 = vpop.permute.xlu2 %613 }
 0x67d   : > { %v507_v41 = vpop.f32.mrf.mxu2 }
 0x67e   : > { %v511_v42 = vpack.c.bf16 %v507_v41, %v507_v41 }
 0x680   : > { %1064 = vmatmul.msk.bf16.vlgmr.msra.gmra.mxu3 %vm297_vm1, %v511_v42 }
 0x685   : > { %v509_v43 = vpop.f32.mrf.mxu2 }
 0x690   : > { %1068 = vmatmul.msk.bf16.vlgmr.msrb.gmra.mxu3 %vm297_vm1, %v614_v44 }
 0x6ec   : > { %v584_v45 = vpop.f32.mrf.mxu1 }
 0x6ed   : > { %v588_v46 = vpack.c.bf16 %v584_v45, %v584_v45 }
 0x6ef   : > { %1067 = vmatmul.msk.bf16.vlgmr.msrb.gmra.mxu2 %vm297_vm1, %v588_v46 }
 0x6f4   : > { %v586_v47 = vpop.f32.mrf.mxu1 }
 0x6ff   : > { %1071 = vmatmul.msk.bf16.vlgmr.msra.gmra.mxu2 %vm297_vm1, %v691_v48 }
 0x703   : > { %v527_v49 = vpop.f32.mrf.mxu3 }
 0x704   : > { %v531_v50 = vadd.f32 %v527_v49, %v1573_v7  ;;  %v748_v7 = vunpack.c.l.b16 %v255_v5 }
 0x706   : > { %v749_v9 = vpack.c.b16 %v748_v7, %v748_v7 }
 0x708   : > { %v750_v11 = vrot.slane %v749_v9, 2 }
 0x70a   : > { %v755_v14 = vsel %vm356_vm3, %v750_v11, 0 }
 0x70b   : > { %v529_v51 = vpop.f32.mrf.mxu3 }
 0x713   : > { %v632_v52 = vpop.f32.mrf.mxu3 }
 0x714   : > { %v636_v53 = vsel %vm317_vm2, %v632_v52, -inf }
 0x715   : > { %637 = vmax.xlane.f32.xlu2 %v636_v53 }
 0x71b   : > { %v634_v54 = vpop.f32.mrf.mxu3 }
 0x772   : > { %v608_v55 = vpop.f32.mrf.mxu2 }
 0x773   : > { %v1598_v56 = vadd.f32 %v608_v55, %v531_v50 }
 0x77a   : > { %v610_v57 = vpop.f32.mrf.mxu2 }
 0x782   : > { %v709_v58 = vpop.f32.mrf.mxu2 }
 0x783   : > { %v713_v59 = vsel %vm317_vm2, %v709_v58, -inf }
 0x784   : > { %714 = vmax.xlane.f32.xlu0 %v713_v59 }
 0x788   : > { %v638_v60 = vpop.xlane.xlu2 %637 }
 0x789   : > { %v639_v61 = vsub.f32 %v632_v52, %v638_v60 }
 0x78a   : > { %v711_v62 = vpop.f32.mrf.mxu2 }
 0x78b   : > { %v640_v63 = vmul.f32 1.442695, %v639_v61 }
 0x78d   : > { %1195 = vpow2.f32 %v640_v63 }
 0x793   : > { %v1196_v0 = vpop.eup %1195 }
 0x794   : > { %v642_v1 = vsel %vm317_vm2, %v1196_v0, 0.0 }
 0x795   : > { %643 = vadd.xlane.f32.xlu1 %v642_v1 }
 0x798   : > { %648 = vrot.lane.b32.xlu0 %v1538_v6, %s1392_s13  ;;  %s931_s13 = scalar_lea.sflag [#allocation4], %s1525_s14 }
 0x7a0   : > { %850 = vrot.lane.b32.xlu0 %v1538_v6, %s1393_s29  ;;  %s1315_s29 = sshra.s32 %s946_s23, 4  ;;  %s1316_s29 = int_to_ptr.hbm [resolvable:$true] %s1315_s29 }
 0x7a1   : > { %p1322_p12 = scmp.lt.s32.totalorder %s1316_s29, %s1675_s4 }
 0x7a8   : > { %771 = vrot.lane.b32.xlu0 %v1538_v6, %s1394_s30  ;;  %s1317_s30 = scalar_lea.hbm %s1316_s29, 8 }
 0x7a9   : > { %p1318_p1 = scmp.ne.s32.totalorder %s1316_s29, %s1317_s30 }
 0x7ab   : > { %p1319_p3 = pnand %p1318_p1, %p1494_p4 }
 0x7ad   : > { %p1320_p5 = pneg %p1319_p3 }
 0x7ae   : > { %725 = vrot.lane.b32.xlu1 %v1538_v6, %s1395_s5 }
 0x7b6   : > { %848 = vrot.lane.b32.xlu1 %v1538_v6, %s1396_s6  ;;  %s1321_s6 = scalar_lea.hbm %s1675_s4, 16 }
 0x7b7   : > { %p1323_p7 = scmp.lt.s32.totalorder %s1321_s6, %s1317_s30 }
 0x7b9   : > { %p1324_p8 = por %p1323_p7, %p1322_p12 }
 0x7bb   : > { %p1325_p9 = pnand %p1324_p8, %p1320_p5 }
 0x7f7   : > { %v715_v2 = vpop.xlane.xlu0 %714 }
 0x7f8   : > { %v716_v3 = vsub.f32 %v709_v58, %v715_v2 }
 0x7fa   : > { %v717_v4 = vmul.f32 1.442695, %v716_v3  ;;  %v256_v3 = vld [vmem:[#allocation7 + $0xc] sm:$0xf] }
 0x7fc   : > { %1197 = vpow2.f32 %v717_v4  ;;  %v832_v4 = vsel %vm356_vm3, %v256_v3, 0 }
 0x802   : > { %v1198_v8 = vpop.eup %1197 }
 0x803   : > { %v719_v10 = vsel %vm317_vm2, %v1198_v8, 0.0 }
 0x804   : > { %720 = vadd.xlane.f32.xlu2 %v719_v10 }
 0x808   : > { %v644_v12 = vpop.xlane.xlu1 %643 }
 0x809   : > { %1199 = vrcp.f32 %v644_v12 }
 0x80a   : > { %v649_v13 = vpop.permute.xlu0 %648 }
 0x80b   : > { %v654_v15 = vsel %vm335_vm4, %v649_v13, 0  ;;  %v906_v13 = vunpack.c.l.b16 %v256_v3 }
 0x80c   : > { %663 = vmatpush.bf16.msrb.mxu0 %v654_v15 }
 0x80f   : > { %v1200_v16 = vpop.eup %1199 }
 0x810   : > { %764 = vmatpush.bf16.msra.mxu0 %v755_v14  ;;  %v646_v17 = vmul.f32 %v1200_v16, %v1196_v0  ;;  %v907_v14 = vpack.c.b16 %v906_v13, %v906_v13 }
 0x812   : > { %v647_v18 = vpack.c.bf16 %v646_v17, %v646_v17  ;;  %v851_v19 = vpop.permute.xlu0 %850  ;;  %v908_v15 = vrot.slane %v907_v14, 2 }
 0x813   : > { %v856_v20 = vsel %vm297_vm1, %v851_v19, 0 }
 0x814   : > { %1069 = vmatmul.msk.bf16.vlgmr.msrb.gmra.mxu0 %vm317_vm2, %v647_v18  ;;  %v913_v16 = vsel %vm356_vm3, %v908_v15, 0 }
 0x815   : > { %865 = vmatpush.bf16.xpose.msrb.mxu0 %v856_v20 }
 0x81a   : > { %v772_v33 = vpop.permute.xlu0 %771 }
 0x81c   : > { %773 = vrot.lane.b32.xlu2 %v1538_v6, %s1397_s7 }
 0x820   : > { %v726_v21 = vpop.permute.xlu1 %725 }
 0x821   : > { %v731_v22 = vsel %vm335_vm4, %v726_v21, 0 }
 0x822   : > { %740 = vmatpush.bf16.msra.mxu3 %v731_v22 }
 0x826   : > { %841 = vmatpush.bf16.msrb.mxu3 %v832_v4 }
 0x828   : > { %v849_v39 = vpop.permute.xlu1 %848 }
 0x877   : > { %v721_v24 = vpop.xlane.xlu2 %720 }
 0x878   : > { %1201 = vrcp.f32 %v721_v24 }
 0x87e   : > { %v1202_v25 = vpop.eup %1201 }
 0x87f   : > { %v723_v26 = vmul.f32 %v1202_v25, %v1198_v8  ;;  %v774_v27 = vpop.permute.xlu2 %773 }
 0x880   : > { %v779_v28 = vsel %vm297_vm1, %v774_v27, 0 }
 0x881   : > { %v724_v29 = vpack.c.bf16 %v723_v26, %v723_v26  ;;  %788 = vmatpush.bf16.xpose.msra.mxu1 %v779_v28 }
 0x883   : > { %1072 = vmatmul.msk.bf16.vlgmr.msra.gmra.mxu3 %vm317_vm2, %v724_v29 }
 0x891   : > { %v665_v30 = vpop.f32.mrf.mxu0 }
 0x892   : > { %v669_v31 = vpack.c.bf16 %v665_v30, %v665_v30 }
 0x894   : > { %1070 = vmatmul.msk.bf16.vlgmr.msrb.gmra.mxu1 %vm297_vm1, %v669_v31 }
 0x899   : > { %v667_v32 = vpop.f32.mrf.mxu0 }
 0x8a4   : > { %1074 = vmatmul.msk.bf16.vlgmr.msra.gmra.mxu1 %vm297_vm1, %v772_v33 }
 0x906   : > { %v742_v34 = vpop.f32.mrf.mxu3 }
 0x907   : > { %v746_v35 = vpack.c.bf16 %v742_v34, %v742_v34 }
 0x909   : > { %1073 = vmatmul.msk.bf16.vlgmr.msra.gmra.mxu0 %vm297_vm1, %v746_v35 }
 0x90e   : > { %v744_v36 = vpop.f32.mrf.mxu3 }
 0x911   : > { %v685_v37 = vpop.f32.mrf.mxu1 }
 0x912   : > { %v689_v38 = vadd.f32 %v685_v37, %v1598_v56 }
 0x919   : > { %v687_v40 = vpop.f32.mrf.mxu1  ;;  %1077 = vmatmul.msk.bf16.vlgmr.msrb.gmra.mxu0 %vm297_vm1, %v849_v39 }
 0x921   : > { %v790_v41 = vpop.f32.mrf.mxu1 }
 0x922   : > { %v794_v42 = vsel %vm317_vm2, %v790_v41, -inf }
 0x923   : > { %795 = vmax.xlane.f32.xlu2 %v794_v42 }
 0x929   : > { %v792_v43 = vpop.f32.mrf.mxu1 }
 0x986   : > { %v766_v44 = vpop.f32.mrf.mxu0 }
 0x987   : > { %v770_v45 = vadd.f32 %v766_v44, %v689_v38 }
 0x98e   : > { %v768_v46 = vpop.f32.mrf.mxu0 }
 0x996   : > { %v796_v47 = vpop.xlane.xlu2 %795  ;;  %v867_v48 = vpop.f32.mrf.mxu0 }
 0x997   : > { %v797_v49 = vsub.f32 %v790_v41, %v796_v47  ;;  %v871_v50 = vsel %vm317_vm2, %v867_v48, -inf }
 0x998   : > { %872 = vmax.xlane.f32.xlu0 %v871_v50 }
 0x999   : > { %v798_v51 = vmul.f32 1.442695, %v797_v49 }
 0x99b   : > { %1203 = vpow2.f32 %v798_v51 }
 0x99e   : > { %v869_v52 = vpop.f32.mrf.mxu0 }
 0x9a1   : > { %v1204_v53 = vpop.eup %1203 }
 0x9a2   : > { %v800_v54 = vsel %vm317_vm2, %v1204_v53, 0.0 }
 0x9a3   : > { %801 = vadd.xlane.f32.xlu1 %v800_v54 }
 0x9ac   : > { %806 = vrot.lane.b32.xlu0 %v1538_v6, %s1398_s9 }
 0x9bc   : > { %883 = vrot.lane.b32.xlu1 %v1538_v6, %s1399_s10 }
 0xa0b   : > { %v873_v55 = vpop.xlane.xlu0 %872 }
 0xa0c   : > { %v874_v56 = vsub.f32 %v867_v48, %v873_v55 }
 0xa0e   : > { %v875_v57 = vmul.f32 1.442695, %v874_v56 }
 0xa10   : > { %1205 = vpow2.f32 %v875_v57 }
 0xa16   : > { %v1206_v58 = vpop.eup %1205  ;;  %v802_v59 = vpop.xlane.xlu1 %801 }
 0xa17   : > { %1207 = vrcp.f32 %v802_v59  ;;  %v877_v60 = vsel %vm317_vm2, %v1206_v58, 0.0 }
 0xa18   : > { %878 = vadd.xlane.f32.xlu2 %v877_v60 }
 0xa1d   : > { %v1208_v61 = vpop.eup %1207 }
 0xa1e   : > { %v804_v62 = vmul.f32 %v1208_v61, %v1204_v53  ;;  %v807_v63 = vpop.permute.xlu0 %806 }
 0xa1f   : > { %v812_v0 = vsel %vm335_vm4, %v807_v63, 0 }
 0xa20   : > { %v805_v1 = vpack.c.bf16 %v804_v62, %v804_v62  ;;  %821 = vmatpush.bf16.msrb.mxu2 %v812_v0 }
 0xa23   : > { %1075 = vmatmul.msk.bf16.vlgmr.msrb.gmra.mxu2 %vm317_vm2, %v805_v1 }
 0xa24   : > { %922 = vmatpush.bf16.msra.mxu2 %v913_v16 }
 0xa2e   : > { %v884_v6 = vpop.permute.xlu1 %883 }
 0xa2f   : > { %v889_v2 = vsel %vm335_vm4, %v884_v6, 0 }
 0xa30   : > { %898 = vmatpush.bf16.msrb.mxu1 %v889_v2 }
 0xa8b   : > { %v879_v5 = vpop.xlane.xlu2 %878 }
 0xa8c   : > { %1209 = vrcp.f32 %v879_v5 }
 0xa92   : > { %v1210_v7 = vpop.eup %1209 }
 0xa93   : > { %v881_v8 = vmul.f32 %v1210_v7, %v1206_v58 }
 0xa95   : > { %v882_v9 = vpack.c.bf16 %v881_v8, %v881_v8 }
 0xa97   : > { %1078 = vmatmul.msk.bf16.vlgmr.msrb.gmra.mxu1 %vm317_vm2, %v882_v9 }
 0xaa6   : > { %v823_v10 = vpop.f32.mrf.mxu2 }
 0xaa7   : > { %v827_v11 = vpack.c.bf16 %v823_v10, %v823_v10 }
 0xaa9   : > { %1076 = vmatmul.msk.bf16.vlgmr.msrb.gmra.mxu3 %vm297_vm1, %v827_v11 }
 0xaae   : > { %v825_v12 = vpop.f32.mrf.mxu2 }
 0xb14   : > { %v900_v17 = vpop.f32.mrf.mxu1 }
 0xb15   : > { %v904_v18 = vpack.c.bf16 %v900_v17, %v900_v17 }
 0xb17   : > { %1079 = vmatmul.msk.bf16.vlgmr.msra.gmra.mxu2 %vm297_vm1, %v904_v18 }
 0xb1c   : > { %v902_v19 = vpop.f32.mrf.mxu1 }
 0xb2c   : > { %v843_v20 = vpop.f32.mrf.mxu3 }
 0xb2d   : > { %v847_v21 = vadd.f32 %v843_v20, %v770_v45 }
 0xb34   : > { %v845_v22 = vpop.f32.mrf.mxu3 }
 0xb9a   : > { %v924_v23 = vpop.f32.mrf.mxu2 }
 0xb9b   : > { %v928_v24 = vadd.f32 %v924_v23, %v847_v21 }
 0xb9d   : > { %929 = vst.msk [vmem:[%s247_s27] sm:$0xff] %vm274_vm0, %v928_v24 }
 0xb9e   : > { %1328 = shalt.err (!%p1325_p9)
}
 0xb9f   : > { %1096 = dma.vmem_to_hbm [thread:$0]  (%p1494_p4), %s944_s28, 128, %s946_s23, %s931_s13  }
 0xba2   : > { %v926_v25 = vpop.f32.mrf.mxu2 }
 0xba3 PF: > { %s957_s14 = sand.u32 1, %s1359_s15   ;;  %p1682_p10 = scmp.ge.s32.totalorder %s1371_s18, 2 }
 0xba4   : > { %s958_s10 = scalar_lea.sflag [#allocation4], %s957_s14 }
 0xba5   : > { %p1110_p13 = pnand %p1682_p10, %p1498_p6 }
 0xba7   : > { %p1111_p11 = pneg %p1110_p13 }
 0xba9   : > { %1354 = dma.done.wait (%p1111_p11), %s958_s10, 128  }
 0xbaa   : > { %1356 = vsyncadd (%p1111_p11), %s958_s10, 4294967168  ;;  %p18_p0 = scmp.ge.s32.totalorder %s1468_s8, 4   ;;  %s1683_s15 = smov %s1363_s16 }
 0xbab   : > { %s1684_s16 = smov %s1367_s17  ;;  %s1685_s17 = smov %s1479_s11 }
 0xbac   : > { %s1686_s18 = smov %s1468_s8  ;;  %20 = sbr.rel (!%p18_p0) target bundleno = 6 (0x6), region = 89 }
 0xbb1   :  { %964 = vsyncpa [#allocation3], 1 }
 0xbb2   :  { %966 = vsyncpa [#allocation3 + $0x1], 1 }
 0xbb3   :  { %967 = vsyncpa [#allocation6], 1 }
 0xbb4   :  { %968 = vsyncpa [#allocation4], 1 }
 0xbb5   :  { %970 = vsyncpa [#allocation4 + $0x1], 1 }

</bundles_post_ra>
